<compile_context>
chip_gen: v5e
topology: v5e:2x2
jax: 0.10.0
libtpu: 0.0.40
codegen_flags: <defaults>
</compile_context>

<pallas_src>
import functools

import jax
import jax.numpy as jnp
from jax.experimental import pallas as pl
from jax.experimental.pallas import tpu as pltpu

STATE_SIZE = 3
ACTION_SIZE = 5
HIDDEN_SIZE = 64

LANES = 128          # lane-dense width for the hidden layers / weight slab
OUT_PAD = 8          # output lanes actually stored to HBM (>= ACTION_SIZE)

# Row offsets inside the packed parameter slab (each segment 8-row aligned).
W1_OFF = 0                        # w1: (3,64)  in rows 0..2,    cols 0..63
B1_OFF = 8                        # b1: row 8,               cols 0..63
W2_OFF, W2_ROWS = 16, 128         # w2: (64,64) in rows 16..79,  cols 0..63
B2_OFF = 144                      # b2: row 144,             cols 0..63
W3_OFF, W3_ROWS = 152, 128        # w3: (64,5)  in rows 152..215, cols 0..4
B3_OFF = 280                      # b3: row 280,             cols 0..4
PARAM_ROWS = 288                  # 288 * 128 * 4 B = 144 KiB


def _round_up(v, m):
    return ((v + m - 1) // m) * m


def qnetwork_kernel(x_ref, p_ref, o_ref, *, precision):
    # x_ref: (tb, 3)   p_ref: (288, 128)   o_ref: (tb, 8)
    x = x_ref[...]
    w1 = p_ref[W1_OFF:W1_OFF + STATE_SIZE, :]        # (3, 128)
    b1 = p_ref[B1_OFF:B1_OFF + 1, :]                 # (1, 128)
    w2 = p_ref[W2_OFF:W2_OFF + W2_ROWS, :]           # (128, 128), tail rows zero
    b2 = p_ref[B2_OFF:B2_OFF + 1, :]
    w3 = p_ref[W3_OFF:W3_OFF + W3_ROWS, :]           # (128, 128), tail rows zero
    b3 = p_ref[B3_OFF:B3_OFF + 1, :]

    h1 = jnp.dot(x, w1, precision=precision,
                 preferred_element_type=jnp.float32) + b1
    h1 = jnp.maximum(h1, 0.0)
    h2 = jnp.dot(h1, w2, precision=precision,
                 preferred_element_type=jnp.float32) + b2
    h2 = jnp.maximum(h2, 0.0)
    y = jnp.dot(h2, w3, precision=precision,
                preferred_element_type=jnp.float32) + b3    # (tb, 128)
    # Store only the useful lanes: 8-wide output block -> 16x less HBM
    # writeback than the previous 128-lane store.
    o_ref[...] = y[:, :OUT_PAD]


def pack_params(params):
    """Pack w1,b1,w2,b2,w3,b3 into one zero-padded (288, 128) f32 slab."""
    slab = jnp.zeros((PARAM_ROWS, LANES), jnp.float32)
    slab = slab.at[W1_OFF:W1_OFF + STATE_SIZE, :HIDDEN_SIZE].set(params["w1"])
    slab = slab.at[B1_OFF, :HIDDEN_SIZE].set(params["b1"][0])
    slab = slab.at[W2_OFF:W2_OFF + HIDDEN_SIZE, :HIDDEN_SIZE].set(params["w2"])
    slab = slab.at[B2_OFF, :HIDDEN_SIZE].set(params["b2"][0])
    slab = slab.at[W3_OFF:W3_OFF + HIDDEN_SIZE, :ACTION_SIZE].set(params["w3"])
    slab = slab.at[B3_OFF, :ACTION_SIZE].set(params["b3"][0])

    # Invariant the kernel relies on: everything outside the six written
    # regions must be zero (the kernel reads 128-row w2/w3 slices and a
    # 128-lane hidden width; the padded rows/lanes must contribute nothing).
    mask = jnp.ones((PARAM_ROWS, LANES), bool)
    mask = mask.at[W1_OFF:W1_OFF + STATE_SIZE, :HIDDEN_SIZE].set(False)
    mask = mask.at[B1_OFF, :HIDDEN_SIZE].set(False)
    mask = mask.at[W2_OFF:W2_OFF + HIDDEN_SIZE, :HIDDEN_SIZE].set(False)
    mask = mask.at[B2_OFF, :HIDDEN_SIZE].set(False)
    mask = mask.at[W3_OFF:W3_OFF + HIDDEN_SIZE, :ACTION_SIZE].set(False)
    mask = mask.at[B3_OFF, :ACTION_SIZE].set(False)
    assert bool(jnp.all(jnp.where(mask, slab, 0.0) == 0.0)), \
        "param slab padding must be zero (kernel reads padded rows/lanes)"
    return slab


def _default_matmul_precision():
    """HIGHEST matches the f32 reference on v6e/v7x (MXU is <5% utilized);
    on v5e use HIGH (bf16x3) so the tiny kernel does not go MXU-bound."""
    try:
        kind = jax.devices()[0].device_kind.lower()
    except Exception:  # pragma: no cover - defensive
        return jax.lax.Precision.HIGHEST
    if "v5e" in kind or "v5 lite" in kind or "v5lite" in kind:
        return jax.lax.Precision.HIGH
    return jax.lax.Precision.HIGHEST


def qnetwork_forward(x, param_slab, tile_rows=4096, precision=None):
    """x: (B, STATE_SIZE) float32. param_slab: packed (288, 128) f32 slab."""
    B = x.shape[0]
    if precision is None:
        precision = _default_matmul_precision()

    # Batch tile selection (multiple of 8 unless it equals the full batch):
    #  * single exact block for small batches (no padding at all),
    #  * even >= 2-step grid for large batches so v7x's 2 TCs both run,
    #  * cap at 4096 rows (~12-16 MiB VMEM incl. double buffers, intermediates).
    max_tb = max(8, (min(int(tile_rows), 4096) // 8) * 8)
    if B <= max_tb:
        tb = _round_up(pl.cdiv(B, 2), 8) if B >= 2048 else B
    else:
        steps = pl.cdiv(B, max_tb)
        steps += steps % 2                      # even step count (v7x megacore)
        tb = min(max_tb, _round_up(pl.cdiv(B, steps), 8))
    grid = (pl.cdiv(B, tb),)                    # partial final block is fine

    flops = 2 * B * (STATE_SIZE * LANES + LANES * LANES + LANES * LANES)
    bytes_accessed = (B * STATE_SIZE + PARAM_ROWS * LANES + B * OUT_PAD) * 4

    out_padded = pl.pallas_call(
        functools.partial(qnetwork_kernel, precision=precision),
        out_shape=jax.ShapeDtypeStruct((B, OUT_PAD), jnp.float32),
        grid=grid,
        in_specs=[
            # x tiles stream over the batch grid; minor dim 3 == full dim.
            pl.BlockSpec((tb, STATE_SIZE), lambda i: (i, 0)),
            # Constant index_map: the parameter slab is fetched once and stays
            # VMEM-resident across all grid iterations.
            pl.BlockSpec((PARAM_ROWS, LANES), lambda i: (0, 0)),
        ],
        out_specs=pl.BlockSpec((tb, OUT_PAD), lambda i: (i, 0)),
        compiler_params=pltpu.CompilerParams(
            dimension_semantics=("parallel",),          # megacore on v7x
            vmem_limit_bytes=32 * 1024 * 1024,          # safe on v7x's 64 MiB
        ),
        cost_estimate=pl.CostEstimate(
            flops=flops, transcendentals=0, bytes_accessed=bytes_accessed),
    )(x, param_slab)

    # Slice back to the true (B, ACTION_SIZE) result.
    return out_padded[:, :ACTION_SIZE]


def init_params(key):
    """PyTorch nn.Linear-style init: U(-1/sqrt(fan_in), 1/sqrt(fan_in)).
    Weights stored transposed as (in_features, out_features)."""
    def linear(k, fan_in, fan_out):
        kw, kb = jax.random.split(k)
        bound = 1.0 / jnp.sqrt(jnp.float32(fan_in))
        w = jax.random.uniform(kw, (fan_in, fan_out), jnp.float32, -bound, bound)
        b = jax.random.uniform(kb, (1, fan_out), jnp.float32, -bound, bound)
        return w, b

    k1, k2, k3 = jax.random.split(key, 3)
    w1, b1 = linear(k1, STATE_SIZE, HIDDEN_SIZE)
    w2, b2 = linear(k2, HIDDEN_SIZE, HIDDEN_SIZE)
    w3, b3 = linear(k3, HIDDEN_SIZE, ACTION_SIZE)
    return {"w1": w1, "b1": b1, "w2": w2, "b2": b2, "w3": w3, "b3": b3}


def reference_forward(x, params):
    hp = jax.lax.Precision.HIGHEST
    h1 = jnp.maximum(jnp.dot(x, params["w1"], precision=hp) + params["b1"], 0.0)
    h2 = jnp.maximum(jnp.dot(h1, params["w2"], precision=hp) + params["b2"], 0.0)
    return jnp.dot(h2, params["w3"], precision=hp) + params["b3"]


if __name__ == "__main__":
    key = jax.random.PRNGKey(0)
    k_params, k_x1, k_x2, k_x3 = jax.random.split(key, 4)
    params = init_params(k_params)
    slab = pack_params(params)

    # Tiny batch: single exact block (full-dim BlockSpecs).
    x_small = jax.random.normal(k_x1, (8, STATE_SIZE), jnp.float32)
    out_small = jax.block_until_ready(qnetwork_forward(x_small, slab))
    ref_small = reference_forward(x_small, params)
    assert out_small.shape == (8, ACTION_SIZE)
    assert jnp.allclose(out_small, ref_small, atol=1e-4, rtol=1e-4), \
        "Pallas kernel mismatch vs reference (small batch)"

    # Ragged batch that is not a multiple of 8 (no padding materialized).
    x_rag = jax.random.normal(k_x2, (37, STATE_SIZE), jnp.float32)
    out_rag = jax.block_until_ready(qnetwork_forward(x_rag, slab))
    assert out_rag.shape == (37, ACTION_SIZE)
    assert jnp.allclose(out_rag, reference_forward(x_rag, params),
                        atol=1e-4, rtol=1e-4), \
        "Pallas kernel mismatch vs reference (ragged batch)"

    # Multi-step grid with a partial final block (cdiv grid + masked edge
    # writeback), using a deliberately small tile to force several steps.
    x_big = jax.random.normal(k_x3, (1000, STATE_SIZE), jnp.float32)
    out_big = jax.block_until_ready(qnetwork_forward(x_big, slab, tile_rows=256))
    assert out_big.shape == (1000, ACTION_SIZE)
    assert jnp.allclose(out_big, reference_forward(x_big, params),
                        atol=1e-4, rtol=1e-4), \
        "Pallas kernel mismatch vs reference (multi-step grid)"

    print("KERNEL_OK")
</pallas_src>

<mosaic_0001>
module attributes {stable_mosaic.version = 11 : i64} {
  func.func @qnetwork_kernel(%arg0: i32, %arg1: memref<8x3xf32, #tpu.memory_space<vmem>>, %arg2: memref<288x128xf32, #tpu.memory_space<vmem>>, %arg3: memref<8x8xf32, #tpu.memory_space<vmem>>) attributes {dimension_semantics = [#tpu.dimension_semantics<parallel>], iteration_bounds = array<i64: 1>, scalar_prefetch = 0 : i64, scratch_operands = 0 : i64, tpu.core_type = #tpu.core_type<tc>, window_params = [{transform_indices = @transform_0, window_bounds = array<i64: 8, 3>}, {pipeline_mode = #tpu.pipeline_mode<synchronous>, transform_indices = @transform_1, window_bounds = array<i64: 288, 128>}, {transform_indices = @transform_2, window_bounds = array<i64: 8, 8>}]} {
    %c0 = arith.constant 0 : index
    %c0_0 = arith.constant 0 : index
    %0 = vector.load %arg1[%c0, %c0_0] : memref<8x3xf32, #tpu.memory_space<vmem>>, vector<8x3xf32>
    %c0_1 = arith.constant 0 : index
    %c0_2 = arith.constant 0 : index
    %1 = vector.load %arg2[%c0_1, %c0_2] : memref<288x128xf32, #tpu.memory_space<vmem>>, vector<3x128xf32>
    %c8 = arith.constant 8 : index
    %c0_3 = arith.constant 0 : index
    %2 = vector.load %arg2[%c8, %c0_3] : memref<288x128xf32, #tpu.memory_space<vmem>>, vector<1x128xf32>
    %c16 = arith.constant 16 : index
    %c0_4 = arith.constant 0 : index
    %3 = vector.load %arg2[%c16, %c0_4] : memref<288x128xf32, #tpu.memory_space<vmem>>, vector<128x128xf32>
    %c144 = arith.constant 144 : index
    %c0_5 = arith.constant 0 : index
    %4 = vector.load %arg2[%c144, %c0_5] : memref<288x128xf32, #tpu.memory_space<vmem>>, vector<1x128xf32>
    %c152 = arith.constant 152 : index
    %c0_6 = arith.constant 0 : index
    %5 = vector.load %arg2[%c152, %c0_6] : memref<288x128xf32, #tpu.memory_space<vmem>>, vector<128x128xf32>
    %c280 = arith.constant 280 : index
    %c0_7 = arith.constant 0 : index
    %6 = vector.load %arg2[%c280, %c0_7] : memref<288x128xf32, #tpu.memory_space<vmem>>, vector<1x128xf32>
    %cst = arith.constant dense<0.000000e+00> : vector<8x128xf32>
    %7 = tpu.matmul %0, %1, %cst {dimension_numbers = #tpu.dot_dimension_numbers<[1], [0], [0], [1], [0, 0, 1, 1], [], []>, precision = #tpu.contract_precision<fp32>} : vector<8x3xf32>, vector<3x128xf32>, vector<8x128xf32> -> vector<8x128xf32>
    %8 = vector.broadcast %2 : vector<1x128xf32> to vector<8x128xf32>
    %9 = arith.addf %7, %8 : vector<8x128xf32>
    %cst_8 = arith.constant 0.000000e+00 : f32
    %10 = vector.broadcast %cst_8 : f32 to vector<8x128xf32>
    %11 = arith.maximumf %9, %10 : vector<8x128xf32>
    %cst_9 = arith.constant dense<0.000000e+00> : vector<8x128xf32>
    %12 = tpu.matmul %11, %3, %cst_9 {dimension_numbers = #tpu.dot_dimension_numbers<[1], [0], [0], [1], [0, 0, 1, 1], [], []>, precision = #tpu.contract_precision<fp32>} : vector<8x128xf32>, vector<128x128xf32>, vector<8x128xf32> -> vector<8x128xf32>
    %13 = vector.broadcast %4 : vector<1x128xf32> to vector<8x128xf32>
    %14 = arith.addf %12, %13 : vector<8x128xf32>
    %cst_10 = arith.constant 0.000000e+00 : f32
    %15 = vector.broadcast %cst_10 : f32 to vector<8x128xf32>
    %16 = arith.maximumf %14, %15 : vector<8x128xf32>
    %cst_11 = arith.constant dense<0.000000e+00> : vector<8x128xf32>
    %17 = tpu.matmul %16, %5, %cst_11 {dimension_numbers = #tpu.dot_dimension_numbers<[1], [0], [0], [1], [0, 0, 1, 1], [], []>, precision = #tpu.contract_precision<fp32>} : vector<8x128xf32>, vector<128x128xf32>, vector<8x128xf32> -> vector<8x128xf32>
    %18 = vector.broadcast %6 : vector<1x128xf32> to vector<8x128xf32>
    %19 = arith.addf %17, %18 : vector<8x128xf32>
    %20 = vector.extract_strided_slice %19 {offsets = [0, 0], sizes = [8, 8], strides = [1, 1]} : vector<8x128xf32> to vector<8x8xf32>
    %c0_12 = arith.constant 0 : index
    %c0_13 = arith.constant 0 : index
    %21 = vector.load %arg3[%c0_12, %c0_13] : memref<8x8xf32, #tpu.memory_space<vmem>>, vector<8x8xf32>
    tpu.vector_store %arg3[%c0_12, %c0_13], %20 {strides = array<i32>} : memref<8x8xf32, #tpu.memory_space<vmem>>, vector<8x8xf32>,
    return
  }
  func.func @transform_0(%arg0: i32) -> (i32, i32) {
    %c0_i32 = arith.constant 0 : i32
    %c0_i32_0 = arith.constant 0 : i32
    return %arg0, %c0_i32 : i32, i32
  }
  func.func @transform_1(%arg0: i32) -> (i32, i32) {
    %c0_i32 = arith.constant 0 : i32
    %c0_i32_0 = arith.constant 0 : i32
    %c0_i32_1 = arith.constant 0 : i32
    return %c0_i32, %c0_i32_0 : i32, i32
  }
  func.func @transform_2(%arg0: i32) -> (i32, i32) {
    %c0_i32 = arith.constant 0 : i32
    %c0_i32_0 = arith.constant 0 : i32
    return %arg0, %c0_i32 : i32, i32
  }
}

</mosaic_0001>

<bundles_post_ra>
// kernel: tpu_custom_call.1
= control target key start
LH: loop header
LB: loop body
LE: loop exit
PB: predicated region body
PF: predicated region fallthrough
CT: control target
= control target key end

     0   :  { %7 = vsyncpa [#allocation3], 0  ;;  %s1459_s0 = inlined_call_operand.vmem [shape: f32[8,3], index: 0, kind: input, shape index: {}]   ;;  %s1460_s1 = inlined_call_operand.hbm [shape: f32[288,128], index: 1, kind: input, shape index: {}]   ;;  %s1461_s2 = inlined_call_operand.hbm [shape: f32[8,8], index: 2, kind: output, shape index: {}]  }
   0x1   :  { %8 = vsyncpa [#allocation4], 0  ;;  %s15_s11 = sshll.u32 %s1460_s1, 4  ;;  %s984_s12 = smov [#allocation2]   ;;  %s16_s11 = int_to_ptr.hbm [resolvable:$true] %s15_s11 }
   0x2   :  { %s17_s13 = sshll.u32 %s984_s12, 4  ;;  %s985_s14 = smov 128   ;;  %s18_s13 = int_to_ptr.vmem [resolvable:$true] %s17_s13 }
   0x3   :  { %s986_s15 = smov 8  }
   0x4   :  { %23 = dma.hbm_to_vmem [thread:$0]  %s16_s11, 4608, %s18_s13, [#allocation3], %s985_s14, %s985_s14, %s986_s15  }
   0x5   :  { %980 = dma.done.wait [#allocation3], 4608  }
   0x6   :  { %981 = vsyncadd [#allocation3], 4294962688  ;;  %vm70_vm0 = vcmask 1042432   ;;  %vm66_vm1 = vcmask 23552   ;;  %v29_v0 = vld [vmem:[#allocation2] sm:$0x7] }
   0x7   :  { %v28_v1 = vld [vmem:[%s1459_s0] sm:$0xff]  ;;  %v46_v2 = vld [vmem:[#allocation2 + $0x88] sm:$0xff]  ;;  %v72_v3 = vsel %vm70_vm0, %v29_v0, 0  ;;  %v44_v7 = vld [vmem:[#allocation2 + $0x78] sm:$0xff]  ;;  %s987_s0 = smov [#allocation5]   ;;  %s915_s20 = sshll.u32 %s1461_s2, 4  ;;  %s916_s20 = int_to_ptr.hbm [resolvable:$true] %s915_s20 }
   0x8   :  { %v68_v4 = vsel %vm66_vm1, %v28_v1, 0  ;;  %v1009_v5 = vand.u32 4294901760, %v46_v2  ;;  %v45_v6 = vld [vmem:[#allocation2 + $0x80] sm:$0xff]  ;;  %v43_v8 = vld [vmem:[#allocation2 + $0x70] sm:$0xff]  ;;  %v1011_v9 = vand.u32 4294901760, %v72_v3  ;;  %v1017_v12 = vand.u32 4294901760, %v44_v7 }
   0x9   :  { %v1013_v10 = vand.u32 4294901760, %v68_v4  ;;  %v1015_v11 = vand.u32 4294901760, %v45_v6  ;;  %v42_v13 = vld [vmem:[#allocation2 + $0x68] sm:$0xff]  ;;  %v41_v14 = vld [vmem:[#allocation2 + $0x60] sm:$0xff]  ;;  %v1022_v16 = vand.u32 4294901760, %v43_v8  ;;  %v40_v19 = vld [vmem:[#allocation2 + $0x58] sm:$0xff] }
   0xa   :  { %v1020_v15 = vsub.f32 %v46_v2, %v1009_v5  ;;  %v1024_v17 = vand.u32 4294901760, %v42_v13  ;;  %v1026_v18 = vand.u32 4294901760, %v41_v14  ;;  %v116_v20 = vsub.f32 %v72_v3, %v1011_v9  ;;  %90 = vmatpush.msra.mxu0 %v1011_v9  ;;  %166 = vmatpush.msra.mxu3 %v1011_v9  ;;  %v39_v43 = vld [vmem:[#allocation2 + $0x50] sm:$0xff]  ;;  %v38_v44 = vld [vmem:[#allocation2 + $0x48] sm:$0xff]  ;;  %v37_v45 = vld [vmem:[#allocation2 + $0x40] sm:$0xff]  ;;  %s913_s1 = sshll.u32 %s987_s0, 4  ;;  %s914_s1 = int_to_ptr.vmem [resolvable:$true] %s913_s1 }
   0xb   :  { %v92_v21 = vsub.f32 %v68_v4, %v1013_v10  ;;  %v1033_v22 = vsub.f32 %v45_v6, %v1015_v11  ;;  %v1035_v23 = vand.u32 4294901760, %v40_v19  ;;  %v1039_v25 = vsub.f32 %v44_v7, %v1017_v12  ;;  %v36_v49 = vld [vmem:[#allocation2 + $0x38] sm:$0xff]  ;;  %v35_v50 = vld [vmem:[#allocation2 + $0x30] sm:$0xff]  ;;  %v34_v54 = vld [vmem:[#allocation2 + $0x28] sm:$0xff] }
   0xc   :  { %v265_v24 = vand.u32 4294901760, %v1020_v15  ;;  %v1042_v26 = vsub.f32 %v43_v8, %v1022_v16  ;;  %v1045_v27 = vsub.f32 %v42_v13, %v1024_v17  ;;  %143 = vmatpush.msra.mxu2 %v116_v20  ;;  %v117_v29 = vand.u32 4294901760, %v116_v20  ;;  %v33_v3 = vld [vmem:[#allocation2 + $0x20] sm:$0xff]  ;;  %v32_v13 = vld [vmem:[#allocation2 + $0x18] sm:$0xff] }
   0xd   :  { %v93_v28 = vand.u32 4294901760, %v92_v21  ;;  %v271_v30 = vand.u32 4294901760, %v1033_v22  ;;  %v1049_v31 = vsub.f32 %v41_v14, %v1026_v18  ;;  %146 = vmatmul.f32.vlgmr.msra.gmra.mxu2 %v92_v21  ;;  %v277_v33 = vand.u32 4294901760, %v1039_v25 }
   0xe   :  { %v266_v32 = vsub.f32 %v1020_v15, %v265_v24  ;;  %v283_v34 = vand.u32 4294901760, %v1042_v26  ;;  %v289_v35 = vand.u32 4294901760, %v1045_v27  ;;  %192 = vmatpush.msrb.mxu0 %v117_v29  ;;  %v118_v37 = vsub.f32 %v116_v20, %v117_v29  ;;  %223 = vmatpush.msrb.mxu2 %v1009_v5 }
   0xf   :  { %v94_v36 = vsub.f32 %v92_v21, %v93_v28  ;;  %170 = vmatmul.f32.vlgmr.msra.gmra.mxu3 %v93_v28  ;;  %v272_v38 = vsub.f32 %v1033_v22, %v271_v30  ;;  %v295_v39 = vand.u32 4294901760, %v1049_v31  ;;  %v278_v41 = vsub.f32 %v1039_v25, %v277_v33 }
  0x10   :  { %v267_v40 = vand.u32 4294901760, %v266_v32  ;;  %v284_v42 = vsub.f32 %v1042_v26, %v283_v34  ;;  %v119_v47 = vand.u32 4294901760, %v118_v37  ;;  %v290_v52 = vsub.f32 %v1045_v27, %v289_v35  ;;  %225 = vmatpush.msrb.mxu2 %v1015_v11 }
  0x11   :  { %v95_v46 = vand.u32 4294901760, %v94_v36  ;;  %v273_v48 = vand.u32 4294901760, %v272_v38  ;;  %v279_v51 = vand.u32 4294901760, %v278_v41  ;;  %v1073_v53 = vsub.f32 %v40_v19, %v1035_v23 }
  0x12   :  { %268 = vmatpush.msrb.mxu3 %v267_v40  ;;  %120 = vmatpush.msra.mxu1 %v119_v47  ;;  %v296_v55 = vsub.f32 %v1049_v31, %v295_v39  ;;  %v1078_v56 = vand.u32 4294901760, %v39_v43  ;;  %v1080_v57 = vand.u32 4294901760, %v38_v44  ;;  %v1082_v58 = vand.u32 4294901760, %v37_v45  ;;  %v31_v40 = vld [vmem:[#allocation2 + $0x10] sm:$0xff] }
  0x13   :  { %96 = vmatmul.f32.vlgmr.msra.gmra.mxu0 %v95_v46  ;;  %122 = vmatmul.f32.vlgmr.msra.gmra.mxu1 %v1013_v10  ;;  %v285_v59 = vand.u32 4294901760, %v284_v42  ;;  %v301_v60 = vand.u32 4294901760, %v1073_v53  ;;  %v1086_v61 = vand.u32 4294901760, %v36_v49  ;;  %v1088_v62 = vand.u32 4294901760, %v35_v50 }
  0x14   :  { %274 = vmatpush.msrb.mxu3 %v273_v48  ;;  %214 = vmatpush.msrb.mxu1 %v1011_v9  ;;  %v1093_v63 = vsub.f32 %v39_v43, %v1078_v56  ;;  %v1096_v0 = vsub.f32 %v38_v44, %v1080_v57  ;;  %v1099_v1 = vsub.f32 %v37_v45, %v1082_v58  ;;  %v1101_v2 = vand.u32 4294901760, %v34_v54 }
  0x15   :  { %227 = vmatpush.msrb.mxu2 %v1017_v12  ;;  %v291_v4 = vand.u32 4294901760, %v290_v52  ;;  %v302_v6 = vsub.f32 %v1073_v53, %v301_v60  ;;  %v1107_v7 = vsub.f32 %v36_v49, %v1086_v61  ;;  %366 = vmatpush.msra.mxu0 %v1020_v15  ;;  %v297_v14 = vand.u32 4294901760, %v296_v55 }
  0x16   :  { %280 = vmatpush.msrb.mxu3 %v279_v51  ;;  %v307_v8 = vand.u32 4294901760, %v1093_v63  ;;  %v313_v9 = vand.u32 4294901760, %v1096_v0  ;;  %v319_v19 = vand.u32 4294901760, %v1099_v1  ;;  %v1115_v20 = vsub.f32 %v35_v50, %v1088_v62  ;;  %419 = vmatpush.msra.mxu1 %v1009_v5 }
  0x17   :  { %229 = vmatpush.msrb.mxu2 %v1022_v16  ;;  %v1117_v21 = vand.u32 4294901760, %v33_v3  ;;  %v1125_v29 = vsub.f32 %v34_v54, %v1101_v2  ;;  %369 = vmatpush.msra.mxu0 %v1033_v22  ;;  %v303_v32 = vand.u32 4294901760, %v302_v6  ;;  %v325_v37 = vand.u32 4294901760, %v1107_v7 }
  0x18   :  { %286 = vmatpush.msrb.mxu3 %v285_v59  ;;  %v308_v28 = vsub.f32 %v1093_v63, %v307_v8  ;;  %v314_v36 = vsub.f32 %v1096_v0, %v313_v9  ;;  %v1132_v38 = vand.u32 4294901760, %v32_v13  ;;  %421 = vmatpush.msra.mxu1 %v1015_v11  ;;  %v320_v42 = vsub.f32 %v1099_v1, %v319_v19 }
  0x19   :  { %231 = vmatpush.msrb.mxu2 %v1024_v17  ;;  %v331_v43 = vand.u32 4294901760, %v1115_v20  ;;  %v1143_v44 = vsub.f32 %v33_v3, %v1117_v21  ;;  %372 = vmatpush.msra.mxu0 %v1039_v25  ;;  %v1147_v45 = vand.u32 4294901760, %v31_v40  ;;  %v337_v47 = vand.u32 4294901760, %v1125_v29 }
  0x1a   :  { %292 = vmatpush.msrb.mxu3 %v291_v4  ;;  %v309_v41 = vand.u32 4294901760, %v308_v28  ;;  %v315_v46 = vand.u32 4294901760, %v314_v36  ;;  %v1154_v48 = vsub.f32 %v32_v13, %v1132_v38  ;;  %423 = vmatpush.msra.mxu1 %v1017_v12  ;;  %v321_v49 = vand.u32 4294901760, %v320_v42 }
  0x1b   :  { %194 = vmatmul.f32.vlgmr.msrb.gmra.mxu0 %v1013_v10  ;;  %233 = vmatpush.msrb.mxu2 %v1026_v18  ;;  %v332_v50 = vsub.f32 %v1115_v20, %v331_v43  ;;  %v343_v51 = vand.u32 4294901760, %v1143_v44  ;;  %v1164_v52 = vsub.f32 %v31_v40, %v1147_v45  ;;  %v338_v55 = vsub.f32 %v1125_v29, %v337_v47 }
  0x1c   :  { %216 = vmatmul.f32.vlgmr.msrb.gmra.mxu1 %v1013_v10  ;;  %298 = vmatpush.msrb.mxu3 %v297_v14  ;;  %v326_v10 = vsub.f32 %v1107_v7, %v325_v37  ;;  %v349_v59 = vand.u32 4294901760, %v1154_v48  ;;  %vm906_vm2 = vcmask 64512  }
  0x1d   :  { %235 = vmatpush.msrb.mxu2 %v1035_v23  ;;  %375 = vmatpush.msra.mxu0 %v1042_v26  ;;  %v333_v3 = vand.u32 4294901760, %v332_v50  ;;  %v344_v4 = vsub.f32 %v1143_v44, %v343_v51  ;;  %v355_v6 = vand.u32 4294901760, %v1164_v52  ;;  %v339_v13 = vand.u32 4294901760, %v338_v55  ;;  %v60_v26 = vld [vmem:[#allocation2 + $0xf8] sm:$0xff] }
  0x1e   :  { %304 = vmatpush.msrb.mxu3 %v303_v32  ;;  %425 = vmatpush.msra.mxu1 %v1022_v16  ;;  %v327_v54 = vand.u32 4294901760, %v326_v10  ;;  %v350_v14 = vsub.f32 %v1154_v48, %v349_v59  ;;  %v54_v10 = vld [vmem:[#allocation2 + $0xc8] sm:$0xff] }
  0x1f   :  { %237 = vmatpush.msrb.mxu2 %v1078_v56  ;;  %378 = vmatpush.msra.mxu0 %v1045_v27  ;;  %v345_v28 = vand.u32 4294901760, %v344_v4  ;;  %v356_v32 = vsub.f32 %v1164_v52, %v355_v6  ;;  %v59_v27 = vld [vmem:[#allocation2 + $0xf0] sm:$0xff]  ;;  %v1327_v4 = vand.u32 4294901760, %v54_v10 }
  0x20   :  { %310 = vmatpush.msrb.mxu3 %v309_v41  ;;  %427 = vmatpush.msra.mxu1 %v1024_v17  ;;  %v351_v36 = vand.u32 4294901760, %v350_v14 }
  0x21   :  { %239 = vmatpush.msrb.mxu2 %v1080_v57  ;;  %381 = vmatpush.msra.mxu0 %v1049_v31  ;;  %v357_v40 = vand.u32 4294901760, %v356_v32  ;;  %v51_v32 = vld [vmem:[#allocation2 + $0xb0] sm:$0xff] }
  0x22   :  { %316 = vmatpush.msrb.mxu3 %v315_v46  ;;  %429 = vmatpush.msra.mxu1 %v1026_v18  ;;  %v55_v46 = vld [vmem:[#allocation2 + $0xd0] sm:$0xff] }
  0x23   :  { %241 = vmatpush.msrb.mxu2 %v1082_v58  ;;  %384 = vmatpush.msra.mxu0 %v1073_v53 }
  0x24   :  { %322 = vmatpush.msrb.mxu3 %v321_v49  ;;  %431 = vmatpush.msra.mxu1 %v1035_v23  ;;  %v53_v49 = vld [vmem:[#allocation2 + $0xc0] sm:$0xff] }
  0x25   :  { %243 = vmatpush.msrb.mxu2 %v1086_v61  ;;  %387 = vmatpush.msra.mxu0 %v1093_v63 }
  0x26   :  { %328 = vmatpush.msrb.mxu3 %v327_v54  ;;  %433 = vmatpush.msra.mxu1 %v1078_v56  ;;  %v52_v54 = vld [vmem:[#allocation2 + $0xb8] sm:$0xff] }
  0x27   :  { %245 = vmatpush.msrb.mxu2 %v1088_v62  ;;  %390 = vmatpush.msra.mxu0 %v1096_v0 }
  0x28   :  { %334 = vmatpush.msrb.mxu3 %v333_v3  ;;  %435 = vmatpush.msra.mxu1 %v1080_v57  ;;  %v1325_v3 = vand.u32 4294901760, %v55_v46 }
  0x29   :  { %247 = vmatpush.msrb.mxu2 %v1101_v2  ;;  %393 = vmatpush.msra.mxu0 %v1099_v1 }
  0x2a   :  { %340 = vmatpush.msrb.mxu3 %v339_v13  ;;  %437 = vmatpush.msra.mxu1 %v1082_v58 }
  0x2b   :  { %249 = vmatpush.msrb.mxu2 %v1117_v21  ;;  %396 = vmatpush.msra.mxu0 %v1107_v7 }
  0x2c   :  { %346 = vmatpush.msrb.mxu3 %v345_v28  ;;  %439 = vmatpush.msra.mxu1 %v1086_v61  ;;  %v1332_v28 = vand.u32 4294901760, %v53_v49 }
  0x2d   :  { %251 = vmatpush.msrb.mxu2 %v1132_v38  ;;  %399 = vmatpush.msra.mxu0 %v1115_v20 }
  0x2e   :  { %352 = vmatpush.msrb.mxu3 %v351_v36  ;;  %441 = vmatpush.msra.mxu1 %v1088_v62 }
  0x2f   :  { %253 = vmatpush.msrb.mxu2 %v1147_v45  ;;  %402 = vmatpush.msra.mxu0 %v1125_v29 }
  0x30   :  { %358 = vmatpush.msrb.mxu3 %v357_v40  ;;  %443 = vmatpush.msra.mxu1 %v1101_v2  ;;  %v1338_v40 = vsub.f32 %v55_v46, %v1325_v3 }
  0x31   :  { %460 = vmatpush.msra.mxu2 %v265_v24  ;;  %405 = vmatpush.msra.mxu0 %v1143_v44 }
  0x32   :  { %527 = vmatpush.msra.mxu3 %v1009_v5  ;;  %445 = vmatpush.msra.mxu1 %v1117_v21  ;;  %v929_v5 = vld [vmem:[#allocation2 + $0x8] ss:$0 sm:$0xff] }
  0x33   :  { %464 = vmatpush.msra.mxu2 %v271_v30  ;;  %408 = vmatpush.msra.mxu0 %v1154_v48  ;;  %v58_v30 = vld [vmem:[#allocation2 + $0xe8] sm:$0xff] }
  0x34   :  { %529 = vmatpush.msra.mxu3 %v1015_v11  ;;  %447 = vmatpush.msra.mxu1 %v1132_v38 }
  0x35   :  { %468 = vmatpush.msra.mxu2 %v277_v33  ;;  %411 = vmatpush.msra.mxu0 %v1164_v52  ;;  %v1267_v33 = vand.u32 4294901760, %v60_v26 }
  0x36   :  { %531 = vmatpush.msra.mxu3 %v1017_v12  ;;  %449 = vmatpush.msra.mxu1 %v1147_v45 }
  0x37   :  { %472 = vmatpush.msra.mxu2 %v283_v34  ;;  %v1269_v34 = vand.u32 4294901760, %v59_v27 }
  0x38   :  { %533 = vmatpush.msra.mxu3 %v1022_v16  ;;  %v63_v16 = vld [vmem:[#allocation2 + $0x110] sm:$0xff] }
  0x39   :  { %476 = vmatpush.msra.mxu2 %v289_v35  ;;  %v1271_v35 = vand.u32 4294901760, %v58_v30  ;;  %v1289_v63 = vsub.f32 %v59_v27, %v1269_v34 }
  0x3a   :  { %535 = vmatpush.msra.mxu3 %v1024_v17  ;;  %v62_v17 = vld [vmem:[#allocation2 + $0x108] sm:$0xff] }
  0x3b   :  { %480 = vmatpush.msra.mxu2 %v295_v39  ;;  %v1263_v24 = vand.u32 4294901760, %v62_v17  ;;  %v57_v39 = vld [vmem:[#allocation2 + $0xe0] sm:$0xff]  ;;  %v1292_v0 = vsub.f32 %v58_v30, %v1271_v35 }
  0x3c   :  { %537 = vmatpush.msra.mxu3 %v1026_v18  ;;  %v61_v18 = vld [vmem:[#allocation2 + $0x100] sm:$0xff] }
  0x3d   :  { %484 = vmatpush.msra.mxu2 %v301_v60  ;;  %v1265_v25 = vand.u32 4294901760, %v61_v18  ;;  %v1283_v60 = vand.u32 4294901760, %v57_v39  ;;  %v638_v44 = vand.u32 4294901760, %v1292_v0 }
  0x3e   :  { %539 = vmatpush.msra.mxu3 %v1035_v23  ;;  %v1261_v23 = vand.u32 4294901760, %v63_v16 }
  0x3f   :  { %488 = vmatpush.msra.mxu2 %v307_v8  ;;  %v1301_v20 = vsub.f32 %v57_v39, %v1283_v60  ;;  %v639_v14 = vsub.f32 %v1292_v0, %v638_v44 }
  0x40   :  { %541 = vmatpush.msra.mxu3 %v1078_v56  ;;  %v1274_v56 = vsub.f32 %v63_v16, %v1261_v23  ;;  %566 = vmatpush.msrb.mxu0 %v1261_v23 }
  0x41   :  { %492 = vmatpush.msra.mxu2 %v313_v9  ;;  %v644_v52 = vand.u32 4294901760, %v1301_v20  ;;  %v640_v30 = vand.u32 4294901760, %v639_v14  ;;  %v49_v14 = vld [vmem:[#allocation2 + $0xa0] sm:$0xff] }
  0x42   :  { %543 = vmatpush.msra.mxu3 %v1080_v57  ;;  %v1277_v57 = vsub.f32 %v62_v17, %v1263_v24  ;;  %v608_v1 = vand.u32 4294901760, %v1274_v56  ;;  %568 = vmatpush.msrb.mxu0 %v1263_v24 }
  0x43   :  { %496 = vmatpush.msra.mxu2 %v319_v19  ;;  %v632_v19 = vand.u32 4294901760, %v1289_v63  ;;  %v645_v16 = vsub.f32 %v1301_v20, %v644_v52 }
  0x44   :  { %545 = vmatpush.msra.mxu3 %v1082_v58  ;;  %v1280_v58 = vsub.f32 %v61_v18, %v1265_v25  ;;  %v609_v29 = vsub.f32 %v1274_v56, %v608_v1  ;;  %570 = vmatpush.msrb.mxu0 %v1265_v25  ;;  %v656_v18 = vand.u32 4294901760, %v1338_v40 }
  0x45   :  { %500 = vmatpush.msra.mxu2 %v325_v37 }
  0x46   :  { %547 = vmatpush.msra.mxu3 %v1086_v61  ;;  %v620_v7 = vand.u32 4294901760, %v1280_v58  ;;  %572 = vmatpush.msrb.mxu0 %v1267_v33 }
  0x47   :  { %504 = vmatpush.msra.mxu2 %v331_v43 }
  0x48   :  { %549 = vmatpush.msra.mxu3 %v1088_v62  ;;  %v1286_v62 = vsub.f32 %v60_v26, %v1267_v33  ;;  %574 = vmatpush.msrb.mxu0 %v1269_v34  ;;  %v1355_v26 = vand.u32 4294901760, %v51_v32 }
  0x49   :  { %508 = vmatpush.msra.mxu2 %v337_v47  ;;  %v610_v47 = vand.u32 4294901760, %v609_v29 }
  0x4a   :  { %551 = vmatpush.msra.mxu3 %v1101_v2  ;;  %v614_v2 = vand.u32 4294901760, %v1277_v57  ;;  %v626_v9 = vand.u32 4294901760, %v1286_v62  ;;  %576 = vmatpush.msrb.mxu0 %v1271_v35 }
  0x4b   :  { %512 = vmatpush.msra.mxu2 %v343_v51  ;;  %v633_v51 = vsub.f32 %v1289_v63, %v632_v19  ;;  %611 = vmatpush.msrb.mxu1 %v610_v47 }
  0x4c   :  { %553 = vmatpush.msra.mxu3 %v1117_v21  ;;  %v615_v37 = vsub.f32 %v1277_v57, %v614_v2  ;;  %v627_v43 = vsub.f32 %v1286_v62, %v626_v9  ;;  %578 = vmatpush.msrb.mxu0 %v1283_v60 }
  0x4d   :  { %516 = vmatpush.msra.mxu2 %v349_v59 }
  0x4e   :  { %555 = vmatpush.msra.mxu3 %v1132_v38  ;;  %v621_v38 = vsub.f32 %v1280_v58, %v620_v7  ;;  %v616_v48 = vand.u32 4294901760, %v615_v37  ;;  %v628_v13 = vand.u32 4294901760, %v627_v43  ;;  %v1372_v37 = vsub.f32 %v51_v32, %v1355_v26 }
  0x4f   :  { %520 = vmatpush.msra.mxu2 %v355_v6 }
  0x50   :  { %557 = vmatpush.msra.mxu3 %v1147_v45  ;;  %v56_v45 = vld [vmem:[#allocation2 + $0xd8] sm:$0xff]  ;;  %v622_v55 = vand.u32 4294901760, %v621_v38  ;;  %617 = vmatpush.msrb.mxu1 %v616_v48  ;;  %v680_v47 = vand.u32 4294901760, %v1372_v37 }
  0x51   :  { %v1322_v59 = vand.u32 4294901760, %v56_v45 }
  0x52   :  { %623 = vmatpush.msrb.mxu1 %v622_v55 }
  0x53   :  { %v1335_v36 = vsub.f32 %v56_v45, %v1322_v59  ;;  %580 = vmatpush.msrb.mxu0 %v1322_v59 }
  0x54   :  { %629 = vmatpush.msrb.mxu1 %v628_v13 }
  0x55   :  { %v650_v17 = vand.u32 4294901760, %v1335_v36  ;;  %582 = vmatpush.msrb.mxu0 %v1325_v3 }
  0x57   :  { %584 = vmatpush.msrb.mxu0 %v1327_v4 }
  0x59   :  { %586 = vmatpush.msrb.mxu0 %v1332_v28 }
  0x90   :  { %v97_v11 = vpop.f32.mrf.mxu0  ;;  %v123_v15 = vpop.f32.mrf.mxu1 }
  0x91   :  { %v98_v12 = vadd.f32 %v929_v5, %v97_v11  ;;  %v147_v22 = vpop.f32.mrf.mxu2  ;;  %v1342_v5 = vsub.f32 %v54_v10, %v1327_v4  ;;  %v1344_v11 = vand.u32 4294901760, %v52_v54 }
  0x92   :  { %v171_v53 = vpop.f32.mrf.mxu3 }
  0x93   :  { %v124_v31 = vadd.f32 %v123_v15, %v98_v12  ;;  %v634_v15 = vand.u32 4294901760, %v633_v51  ;;  %v662_v39 = vand.u32 4294901760, %v1342_v5  ;;  %588 = vmatpush.msrb.mxu0 %v1344_v11  ;;  %v681_v51 = vsub.f32 %v1372_v37, %v680_v47 }
  0x95   :  { %v148_v61 = vadd.f32 %v147_v22, %v124_v31  ;;  %v1353_v22 = vsub.f32 %v53_v49, %v1332_v28  ;;  %v651_v31 = vsub.f32 %v1335_v36, %v650_v17  ;;  %635 = vmatpush.msrb.mxu1 %v634_v15  ;;  %590 = vmatpush.msrb.mxu0 %v1355_v26  ;;  %v682_v55 = vand.u32 4294901760, %v681_v51  ;;  %v48_v15 = vld [vmem:[#allocation2 + $0x98] sm:$0xff] }
  0x97   :  { %v172_v8 = vadd.f32 %v171_v53, %v148_v61  ;;  %v1363_v53 = vsub.f32 %v52_v54, %v1344_v11  ;;  %v668_v29 = vand.u32 4294901760, %v1353_v22  ;;  %641 = vmatpush.msrb.mxu1 %v640_v30  ;;  %v595_v30 = vand.u32 4294901760, %v48_v15 }
  0x98   :  { %v195_v21 = vpop.f32.mrf.mxu0 }
  0x99   :  { %v196_v41 = vadd.f32 %v195_v21, %v172_v8  ;;  %v217_v42 = vpop.f32.mrf.mxu1  ;;  %v646_v8 = vand.u32 4294901760, %v645_v16  ;;  %v657_v21 = vsub.f32 %v1338_v40, %v656_v18  ;;  %v674_v43 = vand.u32 4294901760, %v1363_v53 }
  0x9a   :  { %v669_v10 = vsub.f32 %v1353_v22, %v668_v29 }
  0x9b   :  { %v218_v50 = vadd.f32 %v217_v42, %v196_v41  ;;  %v652_v41 = vand.u32 4294901760, %v651_v31  ;;  %v663_v42 = vsub.f32 %v1342_v5, %v662_v39  ;;  %647 = vmatpush.msrb.mxu1 %v646_v8  ;;  %v658_v46 = vand.u32 4294901760, %v657_v21 }
  0x9c   :  { %v675_v49 = vsub.f32 %v1363_v53, %v674_v43  ;;  %v697_v8 = vsub.f32 %v48_v15, %v595_v30 }
  0x9d   :  { %v220_v6 = vmax.f32 %v218_v50, 0.0  ;;  %653 = vmatpush.msrb.mxu1 %v652_v41  ;;  %v664_v48 = vand.u32 4294901760, %v663_v42  ;;  %v670_v50 = vand.u32 4294901760, %v669_v10 }
  0x9e   :  { %v676_v54 = vand.u32 4294901760, %v675_v49  ;;  %v698_v41 = vand.u32 4294901760, %v697_v8 }
  0x9f   :  { %v254_v12 = vand.u32 4294901760, %v220_v6  ;;  %659 = vmatpush.msrb.mxu1 %v658_v46 }
  0xa1   :  { %v255_v27 = vsub.f32 %v220_v6, %v254_v12  ;;  %360 = vmatmul.f32.vlgmr.msrb.gmra.mxu3 %v254_v12  ;;  %665 = vmatpush.msrb.mxu1 %v664_v48  ;;  %v50_v6 = vld [vmem:[#allocation2 + $0xa8] sm:$0xff] }
  0xa2   :  { %762 = vmatpush.msrb.mxu3 %v1261_v23  ;;  %v591_v13 = vand.u32 4294901760, %v50_v6 }
  0xa3   :  { %414 = vmatmul.f32.vlgmr.msra.gmra.mxu0 %v255_v27  ;;  %v256_v61 = vand.u32 4294901760, %v255_v27  ;;  %671 = vmatpush.msrb.mxu1 %v670_v50 }
  0xa4   :  { %764 = vmatpush.msrb.mxu3 %v1263_v24  ;;  %v685_v32 = vsub.f32 %v50_v6, %v591_v13  ;;  %592 = vmatpush.msrb.mxu0 %v591_v13 }
  0xa5   :  { %453 = vmatmul.f32.vlgmr.msra.gmra.mxu1 %v256_v61  ;;  %v257_v38 = vsub.f32 %v255_v27, %v256_v61 }
  0xa6   :  { %766 = vmatpush.msrb.mxu3 %v1265_v25  ;;  %677 = vmatpush.msrb.mxu1 %v676_v54  ;;  %v686_v16 = vand.u32 4294901760, %v685_v32 }
  0xa7   :  { %v258_v45 = vand.u32 4294901760, %v257_v38 }
  0xa8   :  { %768 = vmatpush.msrb.mxu3 %v1267_v33  ;;  %683 = vmatpush.msrb.mxu1 %v682_v55  ;;  %v687_v31 = vsub.f32 %v685_v32, %v686_v16 }
  0xa9   :  { %259 = vmatmul.f32.vlgmr.msrb.gmra.mxu2 %v258_v45  ;;  %559 = vmatmul.f32.vlgmr.msra.gmra.mxu3 %v254_v12  ;;  %v699_v45 = vsub.f32 %v697_v8, %v698_v41 }
  0xaa   :  { %709 = vmatpush.msrb.mxu2 %v1274_v56  ;;  %770 = vmatpush.msrb.mxu3 %v1269_v34  ;;  %v688_v21 = vand.u32 4294901760, %v687_v31 }
  0xab   :  { %v700_v46 = vand.u32 4294901760, %v699_v45 }
  0xac   :  { %712 = vmatpush.msrb.mxu2 %v1277_v57  ;;  %772 = vmatpush.msrb.mxu3 %v1271_v35 }
  0xad   :  { %689 = vmatpush.msrb.mxu1 %v688_v21 }
  0xae   :  { %715 = vmatpush.msrb.mxu2 %v1280_v58  ;;  %774 = vmatpush.msrb.mxu3 %v1283_v60 }
  0xb0   :  { %718 = vmatpush.msrb.mxu2 %v1286_v62  ;;  %776 = vmatpush.msrb.mxu3 %v1322_v59 }
  0xb1   :  { %522 = vmatmul.f32.vlgmr.msra.gmra.mxu2 %v254_v12  ;;  %v593_v12 = vand.u32 4294901760, %v49_v14 }
  0xb2   :  { %721 = vmatpush.msrb.mxu2 %v1289_v63  ;;  %778 = vmatpush.msrb.mxu3 %v1325_v3 }
  0xb3   :  { %v691_v27 = vsub.f32 %v49_v14, %v593_v12  ;;  %594 = vmatpush.msrb.mxu0 %v593_v12 }
  0xb4   :  { %724 = vmatpush.msrb.mxu2 %v1292_v0  ;;  %780 = vmatpush.msrb.mxu3 %v1327_v4 }
  0xb5   :  { %v692_v61 = vand.u32 4294901760, %v691_v27  ;;  %596 = vmatpush.msrb.mxu0 %v595_v30 }
  0xb6   :  { %727 = vmatpush.msrb.mxu2 %v1301_v20  ;;  %782 = vmatpush.msrb.mxu3 %v1332_v28 }
  0xb7   :  { %803 = vmatpush.msra.mxu0 %v608_v1  ;;  %v693_v38 = vsub.f32 %v691_v27, %v692_v61 }
  0xb8   :  { %730 = vmatpush.msrb.mxu2 %v1335_v36  ;;  %784 = vmatpush.msrb.mxu3 %v1344_v11 }
  0xb9   :  { %807 = vmatpush.msra.mxu0 %v614_v2  ;;  %v694_v42 = vand.u32 4294901760, %v693_v38 }
  0xba   :  { %733 = vmatpush.msrb.mxu2 %v1338_v40  ;;  %786 = vmatpush.msrb.mxu3 %v1355_v26 }
  0xbb   :  { %811 = vmatpush.msra.mxu0 %v620_v7  ;;  %695 = vmatpush.msrb.mxu1 %v694_v42 }
  0xbc   :  { %736 = vmatpush.msrb.mxu2 %v1342_v5  ;;  %788 = vmatpush.msrb.mxu3 %v591_v13 }
  0xbd   :  { %815 = vmatpush.msra.mxu0 %v626_v9  ;;  %701 = vmatpush.msrb.mxu1 %v700_v46 }
  0xbe   :  { %739 = vmatpush.msrb.mxu2 %v1353_v22  ;;  %790 = vmatpush.msrb.mxu3 %v593_v12 }
  0xbf   :  { %870 = vmatpush.msra.mxu1 %v1261_v23  ;;  %819 = vmatpush.msra.mxu0 %v632_v19  ;;  %v930_v23 = vld [vmem:[#allocation2 + $0x90] ss:$0 sm:$0xff] }
  0xc0   :  { %742 = vmatpush.msrb.mxu2 %v1363_v53  ;;  %792 = vmatpush.msrb.mxu3 %v595_v30 }
  0xc1   :  { %872 = vmatpush.msra.mxu1 %v1263_v24  ;;  %823 = vmatpush.msra.mxu0 %v638_v44  ;;  %v931_v44 = vld [vmem:[#allocation2 + $0x118] ss:$0 sm:$0xff] }
  0xc2   :  { %745 = vmatpush.msrb.mxu2 %v1372_v37 }
  0xc3   :  { %874 = vmatpush.msra.mxu1 %v1265_v25  ;;  %827 = vmatpush.msra.mxu0 %v644_v52 }
  0xc4   :  { %748 = vmatpush.msrb.mxu2 %v685_v32 }
  0xc5   :  { %876 = vmatpush.msra.mxu1 %v1267_v33  ;;  %831 = vmatpush.msra.mxu0 %v650_v17 }
  0xc6   :  { %751 = vmatpush.msrb.mxu2 %v691_v27 }
  0xc7   :  { %878 = vmatpush.msra.mxu1 %v1269_v34  ;;  %835 = vmatpush.msra.mxu0 %v656_v18 }
  0xc8   :  { %754 = vmatpush.msrb.mxu2 %v697_v8 }
  0xc9   :  { %880 = vmatpush.msra.mxu1 %v1271_v35  ;;  %839 = vmatpush.msra.mxu0 %v662_v39 }
  0xcb   :  { %882 = vmatpush.msra.mxu1 %v1283_v60  ;;  %843 = vmatpush.msra.mxu0 %v668_v29 }
  0xcd   :  { %884 = vmatpush.msra.mxu1 %v1322_v59  ;;  %847 = vmatpush.msra.mxu0 %v674_v43 }
  0xcf   :  { %886 = vmatpush.msra.mxu1 %v1325_v3  ;;  %851 = vmatpush.msra.mxu0 %v680_v47 }
  0xd1   :  { %888 = vmatpush.msra.mxu1 %v1327_v4  ;;  %855 = vmatpush.msra.mxu0 %v686_v16 }
  0xd3   :  { %890 = vmatpush.msra.mxu1 %v1332_v28  ;;  %859 = vmatpush.msra.mxu0 %v692_v61 }
  0xd5   :  { %892 = vmatpush.msra.mxu1 %v1344_v11  ;;  %863 = vmatpush.msra.mxu0 %v698_v41 }
  0xd7   :  { %894 = vmatpush.msra.mxu1 %v1355_v26 }
  0xd9   :  { %896 = vmatpush.msra.mxu1 %v591_v13 }
  0xdb   :  { %898 = vmatpush.msra.mxu1 %v593_v12 }
  0xdd   :  { %900 = vmatpush.msra.mxu1 %v595_v30 }
 0x120   :  { %v415_v35 = vpop.f32.mrf.mxu0 }
 0x122   :  { %v454_v57 = vpop.f32.mrf.mxu1 }
 0x124   :  { %v361_v24 = vpop.f32.mrf.mxu3 }
 0x12c   :  { %v260_v25 = vpop.f32.mrf.mxu2  ;;  %v560_v63 = vpop.f32.mrf.mxu3 }
 0x12d   :  { %v261_v33 = vadd.f32 %v930_v23, %v260_v25 }
 0x12f   :  { %v362_v34 = vadd.f32 %v361_v24, %v261_v33 }
 0x131   :  { %v416_v56 = vadd.f32 %v415_v35, %v362_v34 }
 0x133   :  { %v455_v58 = vadd.f32 %v454_v57, %v416_v56 }
 0x134   :  { %v523_v60 = vpop.f32.mrf.mxu2 }
 0x135   :  { %v524_v62 = vadd.f32 %v523_v60, %v455_v58 }
 0x137   :  { %v561_v0 = vadd.f32 %v560_v63, %v524_v62 }
 0x139   :  { %v563_v1 = vmax.f32 %v561_v0, 0.0 }
 0x13b   :  { %v597_v2 = vand.u32 4294901760, %v563_v1 }
 0x13d   :  { %v598_v7 = vsub.f32 %v563_v1, %v597_v2  ;;  %703 = vmatmul.f32.vlgmr.msrb.gmra.mxu1 %v597_v2 }
 0x13f   :  { %757 = vmatmul.f32.vlgmr.msrb.gmra.mxu2 %v598_v7  ;;  %v599_v9 = vand.u32 4294901760, %v598_v7 }
 0x141   :  { %796 = vmatmul.f32.vlgmr.msrb.gmra.mxu3 %v599_v9  ;;  %v600_v19 = vsub.f32 %v598_v7, %v599_v9 }
 0x143   :  { %v601_v20 = vand.u32 4294901760, %v600_v19 }
 0x145   :  { %602 = vmatmul.f32.vlgmr.msrb.gmra.mxu0 %v601_v20  ;;  %902 = vmatmul.f32.vlgmr.msra.gmra.mxu1 %v597_v2 }
 0x14d   :  { %865 = vmatmul.f32.vlgmr.msra.gmra.mxu0 %v597_v2 }
 0x1ba   :  { %v704_v52 = vpop.f32.mrf.mxu1 }
 0x1c2   :  { %v603_v59 = vpop.f32.mrf.mxu0  ;;  %v758_v28 = vpop.f32.mrf.mxu2 }
 0x1c3   :  { %v604_v3 = vadd.f32 %v931_v44, %v603_v59  ;;  %v903_v18 = vpop.f32.mrf.mxu1 }
 0x1c4   :  { %v797_v40 = vpop.f32.mrf.mxu3 }
 0x1c5   :  { %v705_v4 = vadd.f32 %v704_v52, %v604_v3 }
 0x1c7   :  { %v759_v36 = vadd.f32 %v758_v28, %v705_v4 }
 0x1c9   :  { %v798_v5 = vadd.f32 %v797_v40, %v759_v36 }
 0x1ca   :  { %v866_v11 = vpop.f32.mrf.mxu0 }
 0x1cb   :  { %v867_v17 = vadd.f32 %v866_v11, %v798_v5 }
 0x1cd   :  { %v904_v22 = vadd.f32 %v903_v18, %v867_v17 }
 0x1cf   :  { %907 = vst.msk [vmem:[#allocation5] sm:$0xff] %vm906_vm2, %v904_v22 }
 0x1d0   :  { %918 = dma.vmem_to_hbm [thread:$0]  %s914_s1, 128, %s916_s20, [#allocation4]  }
 0x1d1   :  { %982 = dma.done.wait [#allocation4], 128  }
 0x1d2   :  { %983 = vsyncadd [#allocation4], 4294967168 }
 0x1d3   :  { %923 = vsyncpa [#allocation3], 1 }
 0x1d4   :  { %924 = vsyncpa [#allocation4], 1 }

</bundles_post_ra>
